<compile_context>
chip_gen: v5e
topology: v5e:2x2
jax: 0.10.0
libtpu: 0.0.40
codegen_flags: <defaults>
</compile_context>

<pallas_src>
import functools

import jax
import jax.numpy as jnp
from jax.experimental import pallas as pl
from jax.experimental.pallas import tpu as pltpu


# --------------------------------------------------------------------------
# Pass 1: tiled spatial reduction + channel attention (tiny (B, C) output).
# --------------------------------------------------------------------------
def _msca_reduce_kernel(x_ref, w1t_ref, w2t_ref, bandt_ref, att_ref, acc_ref,
                        *, hw, hw_tile, lane, inv_hw):
    # x_ref:     (b_t, C, hw_tile)  VMEM  -- one spatial tile of a batch block
    # w1t_ref:   (C, C)             VMEM  -- first Linear weight, pre-transposed
    # w2t_ref:   (C, C)             VMEM  -- second Linear weight, pre-transposed
    # bandt_ref: (C, C)             VMEM  -- Conv1d(k=5, pad=2) band matrix (transposed)
    # att_ref:   (b_t, C)           VMEM  -- sigmoid attention map (epilogue write)
    # acc_ref:   (b_t, C, lane) f32 VMEM  -- lane-parallel running spatial sum
    k = pl.program_id(1)

    @pl.when(k == 0)
    def _():
        acc_ref[...] = jnp.zeros_like(acc_ref)

    ragged = (hw % hw_tile) != 0          # static Python bool
    n_chunks = hw_tile // lane            # static
    base = k * hw_tile

    # Hot loop: pure VPU adds of 128-lane chunks; no XLU reduce, no relayout.
    part = None
    for j in range(n_chunks):
        chunk = x_ref[:, :, j * lane:(j + 1) * lane].astype(jnp.float32)
        if ragged:
            idx = base + j * lane + jax.lax.broadcasted_iota(
                jnp.int32, chunk.shape, 2)
            chunk = jnp.where(idx < hw, chunk, 0.0)
        part = chunk if part is None else part + chunk
    acc_ref[...] += part

    @pl.when(k == pl.num_programs(1) - 1)
    def _():
        # Single cross-lane reduce + (C sublane -> lane) relayout, once per block.
        y = jnp.sum(acc_ref[...], axis=-1) * inv_hw          # (b_t, C) pooled mean
        # Local branch: Conv1d along channels as one tiny MXU matmul.
        y_local = jnp.dot(y, bandt_ref[...],
                          preferred_element_type=jnp.float32)
        # Global branch: Linear -> ReLU -> Linear (bias-free).
        hmid = jnp.maximum(
            jnp.dot(y, w1t_ref[...], preferred_element_type=jnp.float32), 0.0)
        y_global = jnp.dot(hmid, w2t_ref[...],
                           preferred_element_type=jnp.float32)
        att_ref[...] = jax.nn.sigmoid(y_local + y_global).astype(att_ref.dtype)


# --------------------------------------------------------------------------
# Pass 2: broadcast (B, C) attention over H*W with lane-dense stores.
# --------------------------------------------------------------------------
def _msca_broadcast_kernel(att_ref, o_ref):
    # att_ref: (1, C, 1); o_ref: (1, C, T_hw) -- lane broadcast, unmasked vst.
    o_ref[...] = jnp.broadcast_to(att_ref[...], o_ref.shape).astype(o_ref.dtype)


# --------------------------------------------------------------------------
# Tile pickers (VMEM-budget aware) and compiler-param helpers.
# --------------------------------------------------------------------------
def _pick_reduce_tile(hw, b_tile, c, itemsize, budget_bytes=24 << 20):
    """Lane-dense spatial tile for pass 1: multiple of 128 (or full hw)."""
    if hw <= 128:
        return hw                              # block equals the full extent
    per_lane = 2 * b_tile * c * itemsize       # double-buffered x tile
    max_lanes = max(128, (budget_bytes // max(per_lane, 1)) // 128 * 128)
    return min(max_lanes, (hw // 128) * 128, 8192)


def _pick_store_tile(hw, c, itemsize, budget_bytes=16 << 20):
    """Large lane-dense output tile for pass 2 (store-bound)."""
    per_lane = 2 * c * itemsize                # two output buffers
    if hw <= 128 or hw * per_lane <= budget_bytes:
        return hw                              # one block per batch row
    max_lanes = max(128, (budget_bytes // per_lane) // 128 * 128)
    return min(max_lanes, (hw // 128) * 128)


def _vmem_limit(bytes_needed):
    """Scoped-VMEM limit with headroom, safe on v5e/v6e/v7x (<= 56 MiB)."""
    return int(min(max(bytes_needed * 5 // 4 + (1 << 20), 32 << 20), 56 << 20))


def _band_matrix_t(conv_w, c):
    """(C, C) matrix B with (y @ B)[:, i] == Conv1d(k=5, pad=2, no bias)(y)[:, i]."""
    jj = jnp.arange(c)[:, None]
    ii = jnp.arange(c)[None, :]
    d = jj - ii + 2
    taps = jnp.asarray(conv_w, jnp.float32).reshape(5)
    return jnp.where((d >= 0) & (d <= 4), taps[jnp.clip(d, 0, 4)], 0.0)


# --------------------------------------------------------------------------
# Wrapper
# --------------------------------------------------------------------------
def msca_pallas(x, conv_w, w1, w2, *, hw_tile=None, store_tile=None):
    """x: (b, c, h, w); conv_w: (5,); w1, w2: (c, c). Returns (b, c, h, w)."""
    b, c, h, w = x.shape
    hw = h * w
    x3 = x.reshape(b, c, hw)

    # Batch-parallel leading axis (megacore on v7x) when alignment allows.
    b_tile = b // 2 if (b % 16 == 0) else b
    nb = b // b_tile

    if hw_tile is None:
        hw_tile = _pick_reduce_tile(hw, b_tile, c, x.dtype.itemsize)
    assert hw_tile == hw or hw_tile % 128 == 0, "hw_tile must be 128-aligned or full"
    n_hw = pl.cdiv(hw, hw_tile)
    lane = min(hw_tile, 128)

    # Pre-transposed weights + conv band matrix built once, outside the kernel.
    w1t = jnp.asarray(w1, jnp.float32).T
    w2t = jnp.asarray(w2, jnp.float32).T
    band_t = _band_matrix_t(conv_w, c)

    pass1_vmem = (2 * b_tile * c * hw_tile * x.dtype.itemsize   # x double-buffer
                  + 3 * 2 * c * c * 4                           # three (C,C) weights
                  + b_tile * c * lane * 4                       # accumulator
                  + 2 * b_tile * c * 4)                         # att output

    att = pl.pallas_call(
        functools.partial(_msca_reduce_kernel,
                          hw=hw, hw_tile=hw_tile, lane=lane, inv_hw=1.0 / hw),
        out_shape=jax.ShapeDtypeStruct((b, c), jnp.float32),
        grid_spec=pltpu.PrefetchScalarGridSpec(
            num_scalar_prefetch=0,
            grid=(nb, n_hw),
            in_specs=[
                pl.BlockSpec((b_tile, c, hw_tile), lambda bi, ki: (bi, 0, ki)),
                pl.BlockSpec((c, c), lambda bi, ki: (0, 0)),
                pl.BlockSpec((c, c), lambda bi, ki: (0, 0)),
                pl.BlockSpec((c, c), lambda bi, ki: (0, 0)),
            ],
            out_specs=pl.BlockSpec((b_tile, c), lambda bi, ki: (bi, 0)),
            scratch_shapes=[pltpu.VMEM((b_tile, c, lane), jnp.float32)],
        ),
        compiler_params=pltpu.CompilerParams(
            dimension_semantics=("parallel", "arbitrary"),
            vmem_limit_bytes=_vmem_limit(pass1_vmem)),
    )(x3, w1t, w2t, band_t)

    # ---- pass 2: broadcast the attention map over H*W (store-bound).
    if store_tile is None:
        store_tile = _pick_store_tile(hw, c, x.dtype.itemsize)
    assert store_tile == hw or store_tile % 128 == 0
    n2 = pl.cdiv(hw, store_tile)
    att3 = att[:, :, None]                                     # (b, c, 1)

    pass2_vmem = 2 * c * store_tile * x.dtype.itemsize + 2 * c * 4

    out3 = pl.pallas_call(
        _msca_broadcast_kernel,
        out_shape=jax.ShapeDtypeStruct((b, c, hw), x.dtype),
        grid_spec=pltpu.PrefetchScalarGridSpec(
            num_scalar_prefetch=0,
            grid=(b, n2),
            in_specs=[pl.BlockSpec((1, c, 1), lambda bi, ki: (bi, 0, 0))],
            out_specs=pl.BlockSpec((1, c, store_tile), lambda bi, ki: (bi, 0, ki)),
        ),
        compiler_params=pltpu.CompilerParams(
            dimension_semantics=("parallel", "parallel"),
            vmem_limit_bytes=_vmem_limit(pass2_vmem)),
    )(att3)

    return out3.reshape(b, c, h, w)


# --------------------------------------------------------------------------
# Pure-JAX reference mirroring the PyTorch forward.
# --------------------------------------------------------------------------
def msca_ref(x, conv_w, w1, w2):
    b, c, h, w = x.shape
    y = jnp.mean(x.astype(jnp.float32), axis=(2, 3))      # (b, c) == avg_pool(x)
    yp = jnp.pad(y, ((0, 0), (2, 2)))
    y_local = jnp.zeros_like(y)
    for k in range(5):
        y_local = y_local + conv_w[k] * yp[:, k:k + c]
    hid = jnp.maximum(y @ w1.T, 0.0)
    y_global = hid @ w2.T
    att = jax.nn.sigmoid(y_local + y_global)
    return jnp.broadcast_to(att[:, :, None, None], x.shape).astype(x.dtype)


if __name__ == "__main__":
    key = jax.random.PRNGKey(0)
    kx, kc, k1, k2, kx2 = jax.random.split(key, 5)

    b, c = 2, 8
    conv_w = jax.random.normal(kc, (5,), dtype=jnp.float32) * 0.3   # Conv1d(1,1,5) squeezed
    w1 = jax.random.normal(k1, (c, c), dtype=jnp.float32) * 0.2     # Linear(c, c), no bias
    w2 = jax.random.normal(k2, (c, c), dtype=jnp.float32) * 0.2     # Linear(c, c), no bias

    # Test 1: 16x16 feature map; hw_tile=128 forces a 2-step spatial reduction
    # (exercises the pl.when init/epilogue and the lane-parallel accumulator).
    x1 = jax.random.normal(kx, (b, c, 16, 16), dtype=jnp.float32)
    out1 = jax.block_until_ready(msca_pallas(x1, conv_w, w1, w2, hw_tile=128))
    ref1 = msca_ref(x1, conv_w, w1, w2)
    assert out1.shape == x1.shape
    assert jnp.max(jnp.abs(out1 - ref1)) < 1e-5, "mismatch vs reference (16x16)"

    # Test 2: 12x12 feature map (H*W = 144, not a multiple of 128) with default
    # tiles; exercises the cdiv grid + masked ragged last tile path.
    x2 = jax.random.normal(kx2, (b, c, 12, 12), dtype=jnp.float32)
    out2 = jax.block_until_ready(msca_pallas(x2, conv_w, w1, w2))
    ref2 = msca_ref(x2, conv_w, w1, w2)
    assert out2.shape == x2.shape
    assert jnp.max(jnp.abs(out2 - ref2)) < 1e-5, "mismatch vs reference (12x12)"

    print("KERNEL_OK")
</pallas_src>

<mosaic_0001>
module attributes {stable_mosaic.version = 11 : i64} {
  func.func @_msca_reduce_kernel(%arg0: i32, %arg1: i32, %arg2: memref<2x8x128xf32, #tpu.memory_space<vmem>>, %arg3: memref<8x8xf32, #tpu.memory_space<vmem>>, %arg4: memref<8x8xf32, #tpu.memory_space<vmem>>, %arg5: memref<8x8xf32, #tpu.memory_space<vmem>>, %arg6: memref<2x8xf32, #tpu.memory_space<vmem>>, %arg7: memref<2x8x128xf32, #tpu.memory_space<vmem>>) attributes {dimension_semantics = [#tpu.dimension_semantics<parallel>, #tpu.dimension_semantics<arbitrary>], iteration_bounds = array<i64: 1, 2>, scalar_prefetch = 0 : i64, scratch_operands = 1 : i64, tpu.core_type = #tpu.core_type<tc>, window_params = [{transform_indices = @transform_0, window_bounds = array<i64: 2, 8, 128>}, {pipeline_mode = #tpu.pipeline_mode<synchronous>, transform_indices = @transform_1, window_bounds = array<i64: 8, 8>}, {pipeline_mode = #tpu.pipeline_mode<synchronous>, transform_indices = @transform_2, window_bounds = array<i64: 8, 8>}, {pipeline_mode = #tpu.pipeline_mode<synchronous>, transform_indices = @transform_3, window_bounds = array<i64: 8, 8>}, {transform_indices = @transform_4, window_bounds = array<i64: 2, 8>}]} {
    %c0_i32 = arith.constant 0 : i32
    %0 = arith.cmpi eq, %arg1, %c0_i32 : i32
    %1 = arith.extui %0 : i1 to i32
    %c0_i32_0 = arith.constant 0 : i32
    %2 = arith.cmpi ne, %1, %c0_i32_0 : i32
    scf.if %2 {
      %cst = arith.constant 0.000000e+00 : f32
      %10 = vector.broadcast %cst : f32 to vector<2x8x128xf32>
      %c0_10 = arith.constant 0 : index
      %c0_11 = arith.constant 0 : index
      %c0_12 = arith.constant 0 : index
      %11 = vector.load %arg7[%c0_10, %c0_11, %c0_12] : memref<2x8x128xf32, #tpu.memory_space<vmem>>, vector<2x8x128xf32>
      tpu.vector_store %arg7[%c0_10, %c0_11, %c0_12], %10 {strides = array<i32>} : memref<2x8x128xf32, #tpu.memory_space<vmem>>, vector<2x8x128xf32>,
    } else {
    }
    %c0 = arith.constant 0 : index
    %c0_1 = arith.constant 0 : index
    %c0_2 = arith.constant 0 : index
    %3 = vector.load %arg2[%c0, %c0_1, %c0_2] : memref<2x8x128xf32, #tpu.memory_space<vmem>>, vector<2x8x128xf32>
    %c0_3 = arith.constant 0 : index
    %c0_4 = arith.constant 0 : index
    %c0_5 = arith.constant 0 : index
    %4 = vector.load %arg7[%c0_3, %c0_4, %c0_5] : memref<2x8x128xf32, #tpu.memory_space<vmem>>, vector<2x8x128xf32>
    %5 = arith.addf %4, %3 : vector<2x8x128xf32>
    %c0_6 = arith.constant 0 : index
    %c0_7 = arith.constant 0 : index
    %c0_8 = arith.constant 0 : index
    %6 = vector.load %arg7[%c0_6, %c0_7, %c0_8] : memref<2x8x128xf32, #tpu.memory_space<vmem>>, vector<2x8x128xf32>
    tpu.vector_store %arg7[%c0_6, %c0_7, %c0_8], %5 {strides = array<i32>} : memref<2x8x128xf32, #tpu.memory_space<vmem>>, vector<2x8x128xf32>,
    %c1_i32 = arith.constant 1 : i32
    %7 = arith.cmpi eq, %arg1, %c1_i32 : i32
    %8 = arith.extui %7 : i1 to i32
    %c0_i32_9 = arith.constant 0 : i32
    %9 = arith.cmpi ne, %8, %c0_i32_9 : i32
    scf.if %9 {
      %c0_10 = arith.constant 0 : index
      %c0_11 = arith.constant 0 : index
      %c0_12 = arith.constant 0 : index
      %10 = vector.load %arg7[%c0_10, %c0_11, %c0_12] : memref<2x8x128xf32, #tpu.memory_space<vmem>>, vector<2x8x128xf32>
      %cst = arith.constant dense<0.000000e+00> : vector<2x8xf32>
      %11 = vector.multi_reduction <add>, %10, %cst [2] : vector<2x8x128xf32> to vector<2x8xf32>
      %cst_13 = arith.constant 3.906250e-03 : f32
      %12 = vector.broadcast %cst_13 : f32 to vector<2x8xf32>
      %13 = arith.mulf %11, %12 : vector<2x8xf32>
      %c0_14 = arith.constant 0 : index
      %c0_15 = arith.constant 0 : index
      %14 = vector.load %arg5[%c0_14, %c0_15] : memref<8x8xf32, #tpu.memory_space<vmem>>, vector<8x8xf32>
      %cst_16 = arith.constant dense<0.000000e+00> : vector<2x8xf32>
      %15 = tpu.matmul %13, %14, %cst_16 {dimension_numbers = #tpu.dot_dimension_numbers<[1], [0], [0], [1], [0, 0, 1, 1], [], []>} : vector<2x8xf32>, vector<8x8xf32>, vector<2x8xf32> -> vector<2x8xf32>
      %c0_17 = arith.constant 0 : index
      %c0_18 = arith.constant 0 : index
      %16 = vector.load %arg3[%c0_17, %c0_18] : memref<8x8xf32, #tpu.memory_space<vmem>>, vector<8x8xf32>
      %cst_19 = arith.constant dense<0.000000e+00> : vector<2x8xf32>
      %17 = tpu.matmul %13, %16, %cst_19 {dimension_numbers = #tpu.dot_dimension_numbers<[1], [0], [0], [1], [0, 0, 1, 1], [], []>} : vector<2x8xf32>, vector<8x8xf32>, vector<2x8xf32> -> vector<2x8xf32>
      %cst_20 = arith.constant 0.000000e+00 : f32
      %18 = vector.broadcast %cst_20 : f32 to vector<2x8xf32>
      %19 = arith.maximumf %17, %18 : vector<2x8xf32>
      %c0_21 = arith.constant 0 : index
      %c0_22 = arith.constant 0 : index
      %20 = vector.load %arg4[%c0_21, %c0_22] : memref<8x8xf32, #tpu.memory_space<vmem>>, vector<8x8xf32>
      %cst_23 = arith.constant dense<0.000000e+00> : vector<2x8xf32>
      %21 = tpu.matmul %19, %20, %cst_23 {dimension_numbers = #tpu.dot_dimension_numbers<[1], [0], [0], [1], [0, 0, 1, 1], [], []>} : vector<2x8xf32>, vector<8x8xf32>, vector<2x8xf32> -> vector<2x8xf32>
      %22 = arith.addf %15, %21 : vector<2x8xf32>
      %23 = arith.negf %22 : vector<2x8xf32>
      %24 = math.exp %23 : vector<2x8xf32>
      %cst_24 = arith.constant 1.000000e+00 : f32
      %25 = vector.broadcast %cst_24 : f32 to vector<2x8xf32>
      %26 = arith.addf %25, %24 : vector<2x8xf32>
      %27 = arith.divf %25, %26 : vector<2x8xf32>
      %c0_25 = arith.constant 0 : index
      %c0_26 = arith.constant 0 : index
      %28 = vector.load %arg6[%c0_25, %c0_26] : memref<2x8xf32, #tpu.memory_space<vmem>>, vector<2x8xf32>
      tpu.vector_store %arg6[%c0_25, %c0_26], %27 {strides = array<i32>} : memref<2x8xf32, #tpu.memory_space<vmem>>, vector<2x8xf32>,
    } else {
    }
    return
  }
  func.func @transform_0(%arg0: i32, %arg1: i32) -> (i32, i32, i32) {
    %c0_i32 = arith.constant 0 : i32
    %c0_i32_0 = arith.constant 0 : i32
    return %arg0, %c0_i32, %arg1 : i32, i32, i32
  }
  func.func @transform_1(%arg0: i32, %arg1: i32) -> (i32, i32) {
    %c0_i32 = arith.constant 0 : i32
    %c0_i32_0 = arith.constant 0 : i32
    %c0_i32_1 = arith.constant 0 : i32
    return %c0_i32, %c0_i32_0 : i32, i32
  }
  func.func @transform_2(%arg0: i32, %arg1: i32) -> (i32, i32) {
    %c0_i32 = arith.constant 0 : i32
    %c0_i32_0 = arith.constant 0 : i32
    %c0_i32_1 = arith.constant 0 : i32
    return %c0_i32, %c0_i32_0 : i32, i32
  }
  func.func @transform_3(%arg0: i32, %arg1: i32) -> (i32, i32) {
    %c0_i32 = arith.constant 0 : i32
    %c0_i32_0 = arith.constant 0 : i32
    %c0_i32_1 = arith.constant 0 : i32
    return %c0_i32, %c0_i32_0 : i32, i32
  }
  func.func @transform_4(%arg0: i32, %arg1: i32) -> (i32, i32) {
    %c0_i32 = arith.constant 0 : i32
    %c0_i32_0 = arith.constant 0 : i32
    return %arg0, %c0_i32 : i32, i32
  }
}

</mosaic_0001>

<bundles_post_ra>
// kernel: tpu_custom_call.1
= control target key start
LH: loop header
LB: loop body
LE: loop exit
PB: predicated region body
PF: predicated region fallthrough
CT: control target
= control target key end

     0   :  { %9 = vsyncpa [#allocation4], 0  ;;  %s1012_s0 = inlined_call_operand.hbm [shape: f32[2,8,256], index: 0, kind: input, shape index: {}]   ;;  %s1013_s1 = inlined_call_operand.hbm [shape: f32[8,8], index: 1, kind: input, shape index: {}]   ;;  %s1014_s2 = inlined_call_operand.hbm [shape: f32[8,8], index: 2, kind: input, shape index: {}]   ;;  %s1015_s3 = inlined_call_operand.hbm [shape: f32[8,8], index: 3, kind: input, shape index: {}]   ;;  %s1016_s4 = inlined_call_operand.hbm [shape: f32[2,8], index: 4, kind: output, shape index: {}]  }
   0x1   :  { %11 = vsyncpa [#allocation4 + $0x1], 0 }
   0x2   :  { %12 = vsyncpa [#allocation7], 0 }
   0x3   :  { %13 = vsyncpa [#allocation10], 0 }
   0x4   :  { %14 = vsyncpa [#allocation5], 0  ;;  %s869_s15 = smov 0   ;;  %s871_s16 = smov 0  }
   0x5   :  { %s873_s17 = smov 0   ;;  %s875_s18 = smov 0  }
   0x6   :  { %s877_s19 = smov 0   ;;  %s879_s20 = smov 0  }
   0x7 LB: > { %s1017_s21 = sadd.s32 4294967295, %s834_s20   ;;  %s41_s22 = sadd.s32 1, %s822_s17  ;;  %s834_s20 = sphi %s879_s20, %s20_s20   ;;  %s830_s19 = sphi %s877_s19, %s1029_s19   ;;  %s826_s18 = sphi %s875_s18, %s1028_s18   ;;  %s822_s17 = sphi %s873_s17, %s1027_s17   ;;  %s818_s16 = sphi %s871_s16, %s1026_s16   ;;  %s814_s15 = sphi %s869_s15, %s1025_s15  }
   0x8   : > { %p48_p0 = scmp.ne.s32.totalorder %s822_s17, %s818_s16  ;;  %p49_p1 = scmp.eq.s32.totalorder %s834_s20, 0 }
   0x9   : > { %p54_p2 = scmp.ne.s32.totalorder %s818_s16, %s814_s15  ;;  %p905_p3 = scmp.eq.s32.totalorder %s1017_s21, 0 }
   0xa   : > { %p909_p4 = por %p49_p1, %p48_p0  ;;  %p501_p5 = scmp.ge.s32.totalorder %s834_s20, 1 }
   0xb   : > { %p916_p6 = por %p905_p3, %p54_p2  ;;  %p154_p7 = scmp.lt.s32.totalorder %s834_s20, 3 }
   0xc   : > { %s166_s28 = sshll.u32 %s1013_s1, 4  ;;  %s836_s30 = smov [#allocation6]   ;;  %s167_s28 = int_to_ptr.hbm [resolvable:$true] %s166_s28 }
   0xd   : > { %p924_p8 = pnand %p501_p5, %p154_p7  ;;  %s168_s5 = sshll.u32 %s836_s30, 4  ;;  %s169_s5 = int_to_ptr.vmem [resolvable:$true] %s168_s5 }
   0xe   : > { %p558_p10 = scmp.lt.s32.totalorder %s834_s20, 2  ;;  %s178_s9 = sshll.u32 %s1014_s2, 4  ;;  %s179_s9 = int_to_ptr.hbm [resolvable:$true] %s178_s9 }
   0xf   : > { %p541_p9 = pneg %p924_p8  ;;  %s837_s11 = smov [#allocation8]  }
  0x10   : > { %p942_p12 = pnand %p558_p10, %p909_p4  ;;  %s180_s12 = sshll.u32 %s837_s11, 4  ;;  %s181_s12 = int_to_ptr.vmem [resolvable:$true] %s180_s12 }
  0x11   : > { %p933_p11 = pnand %p541_p9, %p905_p3  ;;  %s190_s15 = sshll.u32 %s1015_s3, 4  ;;  %s191_s15 = int_to_ptr.hbm [resolvable:$true] %s190_s15 }
  0x12   : > { %s838_s24 = smov [#allocation9]   ;;  %s29_s27 = sadd.s32 1, %s830_s19 }
  0x13   : > { %544 = dma.hbm_to_vmem [thread:$0]  (!%p933_p11), %s167_s28, 128, %s169_s5, [#allocation7]  }
  0x14   : > { %547 = dma.hbm_to_vmem [thread:$0]  (!%p933_p11), %s179_s9, 128, %s181_s12, [#allocation7]  }
  0x15   : > { %s192_s26 = sshll.u32 %s838_s24, 4  ;;  %s203_s28 = sand.u32 1, %s822_s17   ;;  %s193_s26 = int_to_ptr.vmem [resolvable:$true] %s192_s26 }
  0x16   : > { %550 = dma.hbm_to_vmem [thread:$0]  (!%p933_p11), %s191_s15, 128, %s193_s26, [#allocation10]  }
  0x17   : > { %p30_p13 = scmp.ge.s32.totalorder %s29_s27, 2  ;;  %s506_s30 = sshll.u32 %s203_s28, 4 }
  0x18   : > { %s507_s5 = sshll.u32 %s830_s19, 3  ;;  %s207_s13 = scalar_lea.vmem [#allocation3], %s506_s30 }
  0x19   : > { %s1031_s27 = smov (%p30_p13, %s29_s27), 0  ;;  %s214_s9 = scalar_lea.hbm %s1012_s0, %s507_s5 }
  0x1a   : > { %s37_s11 = ssub.s32 %s830_s19, %s1031_s27  ;;  %s215_s12 = sshll.u32 %s214_s9, 4  ;;  %s216_s12 = int_to_ptr.hbm [resolvable:$true] %s215_s12 }
  0x1b   : > { %p39_p0 = scmp.eq.s32.totalorder %s37_s11, 0  ;;  %s217_s6 = sshll.u32 %s207_s13, 4  ;;  %s218_s6 = int_to_ptr.vmem [resolvable:$true] %s217_s6 }
  0x1c   : > { %s204_s15 = scalar_lea.sflag [#allocation4], %s203_s28  ;;  %s839_s24 = smov 256  }
  0x1d   : > { %s968_s14 = scalar_select %p39_p0, %s822_s17, %s41_s22  }
  0x1e   : > { %s840_s26 = smov 128   ;;  %s841_s21 = smov 8  }
  0x1f   : > { %554 = dma.hbm_to_vmem [thread:$0]  (!%p942_p12), %s216_s12, 256, %s218_s6, %s204_s15, %s839_s24, %s840_s26, %s841_s21  }
  0x20   : > { %229 = sbr.rel (%p924_p8) target bundleno = 488 (0x1e8), region = 36  ;;  %s231_s5 = sand.u32 (!%p924_p8), 1, %s818_s16  }
  0x21   : > { %s509_s7 = sshll.u32 (!%p924_p8), %s231_s5, 4  ;;  %s232_s8 = scalar_lea.sflag (!%p924_p8), [#allocation4], %s231_s5 }
  0x22   : > { %s235_s30 = scalar_lea.vmem (!%p924_p8), [#allocation3], %s509_s7 }
  0x25   : > { %797 = dma.done.wait (%p916_p6), %s232_s8, 256  }
  0x26   : > { %799 = vsyncadd (%p916_p6), %s232_s8, 4294967040 }
  0x27   : > { %801 = dma.done.wait (%p905_p3), [#allocation7], 256  }
  0x28   : > { %803 = vsyncadd (%p905_p3), [#allocation7], 4294967040 }
  0x29   : > { %805 = dma.done.wait (%p905_p3), [#allocation10], 128  }
  0x2a   : > { %807 = vsyncadd (%p905_p3), [#allocation10], 4294967168  ;;  %p513_p1 = scmp.ne.s32.totalorder %s826_s18, 0 }
  0x2c   : > { %275 = sbr.rel (%p513_p1) target bundleno = 52 (0x34), region = 56 }
  0x31   : > { %v842_v0 = vmov 0.0  }
  0x32   : > { %276 = vst [vmem:[#allocation2] sm:$0xff] %v842_v0 }
  0x33   : > { %277 = vst [vmem:[#allocation2 + $0x8] sm:$0xff] %v842_v0 }
  0x34 PF: > { %v278_v1 = vld [vmem:[%s235_s30] sm:$0xff]  ;;  %v279_v3 = vld [vmem:[%s235_s30 + $0x8] sm:$0xff]  ;;  %p514_p2 = scmp.ne.s32.totalorder %s826_s18, 1 }
  0x39   : > { %v280_v2 = vld [vmem:[#allocation2] sm:$0xff]  ;;  %289 = sbr.rel (%p514_p2) target bundleno = 482 (0x1e2), region = 60 }
  0x3a   : > { %v282_v4 = vadd.f32 %v280_v2, %v278_v1  ;;  %v281_v5 = vld [vmem:[#allocation2 + $0x8] sm:$0xff] }
  0x3b   : > { %v283_v6 = vadd.f32 %v281_v5, %v279_v3 }
  0x3c   : > { %284 = vst [vmem:[#allocation2] sm:$0xff] %v282_v4 }
  0x3d   : > { %285 = vst [vmem:[#allocation2 + $0x8] sm:$0xff] %v283_v6 }
  0x3e   : > { %v299_v9 = vld [vmem:[#allocation6] sm:$0xff]  ;;  %v298_v10 = vld [vmem:[#allocation9] sm:$0xff]  ;;  %v302_v12 = vlaneseq  ;;  %vm306_vm0 = vcmask 1041409   ;;  %vm308_vm1 = vcmask 64512   ;;  %v332_v20 = vld [vmem:[#allocation8] sm:$0xff]  ;;  %vm395_vm5 = vcmask 58368  }
  0x3f   : > { %326 = vmatpush.msra.mxu0 %v299_v9  ;;  %371 = vmatpush.msra.mxu2 %v298_v10 }
  0x40   : > { %v303_v13 = vand.u32 127, %v302_v12  ;;  %351 = vmatpush.msra.mxu1 %v332_v20 }
  0x43   : > { %v290_v7 = vld [vmem:[#allocation2] sm:$0xff] }
  0x44   : > { %292 = vadd.xlane.f32.xlu0 %v290_v7  ;;  %v291_v8 = vld [vmem:[#allocation2 + $0x8] sm:$0xff] }
  0x4c   : > { %294 = vadd.xlane.f32.xlu0 %v291_v8 }
  0xb7   : > { %v293_v11 = vpop.xlane.xlu0 %292 }
  0xb8   : > { %v296_v14 = vmul.f32 0.00390625, %v293_v11 }
  0xba   : > { %v304_v17 = vperm.slane %v296_v14, %v303_v13 }
  0xbf   : > { %v295_v15 = vpop.xlane.xlu0 %294 }
  0xc0   : > { %v297_v16 = vmul.f32 0.00390625, %v295_v15 }
  0xc2   : > { %v305_v18 = vperm.slane %v297_v16, %v303_v13 }
  0xc4   : > { %v307_v19 = vsel %vm306_vm0, %v305_v18, %v304_v17 }
  0xc5   : > { %515 = vmatmul.msk.f32.vlgmr.msra.gmra.mxu0 %vm308_vm1, %v307_v19  ;;  %517 = vmatmul.msk.f32.vlgmr.msra.gmra.mxu2 %vm308_vm1, %v307_v19 }
 0x142   : > { %v328_v21 = vpop.f32.mrf.mxu0 }
 0x143   : > { %v331_v22 = vmax.f32 %v328_v21, 0.0 }
 0x145   : > { %516 = vmatmul.msk.f32.vlgmr.msra.gmra.mxu1 %vm308_vm1, %v331_v22 }
 0x148   : > { %v373_v23 = vpop.f32.mrf.mxu2 }
 0x1c2   : > { %v353_v24 = vpop.f32.mrf.mxu1 }
 0x1c3   : > { %v374_v25 = vadd.f32 %v373_v23, %v353_v24 }
 0x1c5   : > { %v518_v26 = vmul.f32 -1.442695, %v374_v25 }
 0x1c7   : > { %620 = vpow2.f32 %v518_v26 }
 0x1cd   : > { %v621_v27 = vpop.eup %620 }
 0x1ce   : > { %v379_v28 = vadd.f32 1.0, %v621_v27 }
 0x1d0   : > { %622 = vrcp.f32 %v379_v28  ;;  %v391_v32 = vand.u32 2147483648, %v379_v28  ;;  %v389_v34 = vand.u32 2147483647, %v379_v28  ;;  %vm385_vm3 = vweird.f32 %v379_v28 }
 0x1d2   : > { %v392_v36 = vor.u32 1.1754944e-38, %v391_v32  ;;  %vm390_vm6 = vcmp.eq.f32.partialorder %v389_v34, 8.507059e+37 }
 0x1d6   : > { %v623_v29 = vpop.eup %622 }
 0x1d7   : > { %v381_v30 = vmul.f32 %v623_v29, %v379_v28  ;;  %vm386_vm2 = vweird.f32 %v623_v29 }
 0x1d8   : > { %vm387_vm4 = vmor %vm385_vm3, %vm386_vm2 }
 0x1d9   : > { %v382_v31 = vsub.f32 1.0, %v381_v30 }
 0x1db   : > { %v383_v33 = vmul.f32 %v623_v29, %v382_v31 }
 0x1dd   : > { %v384_v35 = vadd.f32 %v623_v29, %v383_v33 }
 0x1df   : > { %v388_v37 = vsel %vm387_vm4, %v623_v29, %v384_v35 }
 0x1e0   : > { %v393_v38 = vsel %vm390_vm6, %v392_v36, %v388_v37 }
 0x1e1   : > { %396 = vst.msk [vmem:[#allocation11] sm:$0x3] %vm395_vm5, %v393_v38 }
 0x1e2 PF: > { %s1024_s18 = sadd.s32 4294967295, %s834_s20   ;;  %s407_s23 = sshll.u32 %s1016_s4, 4  ;;  %s408_s23 = int_to_ptr.hbm [resolvable:$true] %s407_s23 }
 0x1e3   : > { %p562_p3 = scmp.eq.s32.totalorder %s1024_s18, 1  ;;  %s843_s25 = smov [#allocation11]  }
 0x1e4   : > { %s405_s29 = sshll.u32 %s843_s25, 4  ;;  %s406_s29 = int_to_ptr.vmem [resolvable:$true] %s405_s29 }
 0x1e5   : > { %538 = dma.vmem_to_hbm [thread:$0]  (%p562_p3), %s406_s29, 32, %s408_s23, [#allocation5]  }
 0x1e6   : > { %809 = dma.done.wait (%p562_p3), [#allocation5], 32  }
 0x1e7   : > { %811 = vsyncadd (%p562_p3), [#allocation5], 4294967264 }
 0x1e8 PF: > { %s20_s20 = sadd.s32 1, %s834_s20   ;;  %s1025_s15 = smov %s818_s16 }
 0x1e9   : > { %p17_p4 = scmp.ge.s32.totalorder %s20_s20, 4   ;;  %s1026_s16 = smov %s822_s17 }
 0x1ea   : > { %s1027_s17 = smov %s968_s14  ;;  %s1028_s18 = smov %s830_s19 }
 0x1eb   : > { %s1029_s19 = smov %s1031_s27  ;;  %19 = sbr.rel (!%p17_p4) target bundleno = 7 (0x7), region = 94 }
 0x1f0   :  { %421 = vsyncpa [#allocation4], 1 }
 0x1f1   :  { %423 = vsyncpa [#allocation4 + $0x1], 1 }
 0x1f2   :  { %424 = vsyncpa [#allocation7], 1 }
 0x1f3   :  { %425 = vsyncpa [#allocation10], 1 }
 0x1f4   :  { %426 = vsyncpa [#allocation5], 1 }
 0x1f5   :  { %428 = vsyncpa [#allocation5 + $0x1], 1 }

</bundles_post_ra>
